<compile_context>
chip_gen: v7x
topology: tpu7x:2x2x1
jax: 0.10.0
libtpu: 0.0.40
codegen_flags: <defaults>
</compile_context>

<pallas_src>
import functools

import jax
import jax.numpy as jnp
from jax import lax
from jax.experimental import pallas as pl
from jax.experimental.pallas import tpu as pltpu

HEAD_PAD = 128   # lane-dense padded width of the fused head output
ROW_ALIGN = 16   # sublane/packing alignment (covers bf16's (16,128) tile)


def _round_up(a, b):
    return ((a + b - 1) // b) * b


def policy_kernel(x_ref, w1_ref, b1_ref, wh_ref, bh_ref, out_ref, *, nact):
    # Layer 1: (TB, F) bf16 @ (F, 256) bf16 on MXU, f32 accumulation;
    # bias + ReLU on VPU in f32 (v5e VPU/EUP have no bf16).
    h = jnp.dot(x_ref[...], w1_ref[...], preferred_element_type=jnp.float32)
    h = jnp.maximum(h + b1_ref[...], 0.0)

    # Fused heads: one (TB, 256) f32 @ (256, 128) f32 matmul.
    # cols [0:nact] = action logits, col nact = state value, rest = zero padding.
    heads = jnp.dot(h, wh_ref[...], preferred_element_type=jnp.float32) + bh_ref[...]

    # Softmax restricted to the first `nact` lanes (masked lanes -> -inf -> exp 0).
    col = lax.broadcasted_iota(jnp.int32, heads.shape, 1)
    is_prob = col < nact
    logits = jnp.where(is_prob, heads, -jnp.inf)
    m = jnp.max(logits, axis=-1, keepdims=True)
    e = jnp.exp(logits - m)
    denom = jnp.sum(e, axis=-1, keepdims=True)
    r = pl.reciprocal(denom, approx=True)   # EUP vrcp (otherwise-idle slot)
    r = r * (2.0 - denom * r)               # one Newton step: removes ~1e-3 bias
    probs = e * r

    # Single lane-dense (TB, 128) store: probs | value | zeros (probs==0 on pad lanes).
    out_ref[...] = jnp.where(col == nact, heads, probs).astype(out_ref.dtype)


def prepare_params(w1, b1, wa, ba, wv, bv):
    """Hoisted parameter prep: call ONCE at init / after each parameter update.

    Fuses the action and value heads into one lane-dense (H, 128) weight and
    (1, 128) bias (padded columns are exactly zero), and stores the first-layer
    weight in bf16 (the MXU's native format).
    """
    H = w1.shape[1]
    nact = wa.shape[1]
    assert nact + 1 <= HEAD_PAD
    w_heads = (jnp.zeros((H, HEAD_PAD), jnp.float32)
               .at[:, :nact].set(wa.astype(jnp.float32))
               .at[:, nact:nact + 1].set(wv.astype(jnp.float32)))
    b_heads = (jnp.zeros((1, HEAD_PAD), jnp.float32)
               .at[:, :nact].set(ba.astype(jnp.float32))
               .at[:, nact:nact + 1].set(bv.astype(jnp.float32)))
    return dict(
        w1=w1.astype(jnp.bfloat16),
        b1=b1.astype(jnp.float32),
        w_heads=w_heads,
        b_heads=b_heads,
        nact=int(nact),
    )


def policy_forward(x, params, *, block_b=4096, return_fused=False):
    """x:(B,F); params from prepare_params().

    Returns (action_prob (B,nact), state_values (B,1)), or — with
    return_fused=True — the padded lane-dense (B_al,128) block (cols [0:nact]
    = probs, col nact = value) so consumers can index it without an extra
    HBM pass over the padded output.
    """
    w1, b1 = params["w1"], params["b1"]
    wh, bh = params["w_heads"], params["b_heads"]
    nact = params["nact"]
    B, F = x.shape
    H = w1.shape[1]

    # bf16 input to the first matmul (halves x HBM/VMEM; accumulation stays f32).
    # TODO(synk): have the upstream producer emit x in bf16 so this cast fuses away.
    x = x.astype(jnp.bfloat16)

    # Pad only up to sublane/packing alignment (<= 15 rows). The ragged last
    # TB-tile is handled by Pallas: OOB rows are computed but never stored.
    B_al = _round_up(max(B, ROW_ALIGN), ROW_ALIGN)
    if B_al != B:
        x = jnp.pad(x, ((0, B_al - B), (0, 0)))

    # Batch tile: large enough to amortize per-grid-step overhead, capped so the
    # grid has >= 2 steps (keeps both v7x TensorCores busy; harmless on 1-TC chips).
    TB = min(_round_up(block_b, ROW_ALIGN),
             max(ROW_ALIGN, _round_up(pl.cdiv(B_al, 2), ROW_ALIGN)))
    grid = (pl.cdiv(B_al, TB),)

    kernel = functools.partial(policy_kernel, nact=nact)

    out = pl.pallas_call(
        kernel,
        out_shape=jax.ShapeDtypeStruct((B_al, HEAD_PAD), jnp.float32),
        grid_spec=pltpu.PrefetchScalarGridSpec(
            num_scalar_prefetch=0,
            grid=grid,
            in_specs=[
                pl.BlockSpec((TB, F), lambda i: (i, 0)),          # x: tiled over batch
                pl.BlockSpec((F, H), lambda i: (0, 0)),           # weights stay resident
                pl.BlockSpec((1, H), lambda i: (0, 0)),
                pl.BlockSpec((H, HEAD_PAD), lambda i: (0, 0)),
                pl.BlockSpec((1, HEAD_PAD), lambda i: (0, 0)),
            ],
            out_specs=pl.BlockSpec((TB, HEAD_PAD), lambda i: (i, 0)),
        ),
        compiler_params=pltpu.CompilerParams(
            dimension_semantics=("parallel",),   # shards batch grid across v7x's 2 TCs
            vmem_limit_bytes=32 << 20,           # v5e default is 16 MiB; TB<=4096 fits
        ),
    )(x, w1, b1, wh, bh)

    if return_fused:
        return out

    action_prob = out[:B, :nact]
    state_values = out[:B, nact:nact + 1]
    return action_prob, state_values


def init_linear(key, fan_in, fan_out):
    # Deterministic init mimicking nn.Linear's uniform(-1/sqrt(fan_in), +...).
    kw, kb = jax.random.split(key)
    bound = 1.0 / jnp.sqrt(fan_in)
    # stored as (in, out) so the kernel can do x @ W
    w = jax.random.uniform(kw, (fan_in, fan_out), jnp.float32, -bound, bound)
    b = jax.random.uniform(kb, (1, fan_out), jnp.float32, -bound, bound)
    return w, b


if __name__ == "__main__":
    # Small shapes consistent with the module:
    nact = 8
    num_state_elem = 4
    nn_input_size = nact * num_state_elem   # 32
    hidden = 256
    batch = 2

    key = jax.random.PRNGKey(0)
    kx, k1, k2, k3 = jax.random.split(key, 4)

    x = jax.random.normal(kx, (batch, nn_input_size), jnp.float32)

    w1, b1 = init_linear(k1, nn_input_size, hidden)   # affine
    wa, ba = init_linear(k2, hidden, nact)            # action_head
    wv, bv = init_linear(k3, hidden, 1)               # value_head

    params = prepare_params(w1, b1, wa, ba, wv, bv)   # hoisted: once per init/update
    fwd = jax.jit(lambda xx: policy_forward(xx, params))

    action_prob, state_values = fwd(x)
    jax.block_until_ready((action_prob, state_values))

    assert action_prob.shape == (batch, nact)
    assert state_values.shape == (batch, 1)

    # Exact-path reference (same bf16 input quantization, f32 accumulation).
    xb = x.astype(jnp.bfloat16).astype(jnp.float32)
    w1b = w1.astype(jnp.bfloat16).astype(jnp.float32)
    h_ref = jnp.maximum(xb @ w1b + b1, 0.0)
    prob_ref = jax.nn.softmax(h_ref @ wa + ba, axis=-1)
    val_ref = h_ref @ wv + bv
    assert jnp.allclose(action_prob, prob_ref, atol=1e-4, rtol=1e-4)
    assert jnp.allclose(state_values, val_ref, atol=1e-4, rtol=1e-4)
    assert jnp.allclose(jnp.sum(action_prob, axis=-1), 1.0, atol=1e-4)

    # Loose check against the pure-f32 module semantics (bf16 input quantization only).
    h32 = jnp.maximum(x @ w1 + b1, 0.0)
    assert jnp.allclose(action_prob, jax.nn.softmax(h32 @ wa + ba, axis=-1), atol=5e-2)
    assert jnp.allclose(state_values, h32 @ wv + bv, atol=5e-2)

    print("KERNEL_OK")
</pallas_src>

<mosaic_0001>
module attributes {stable_mosaic.version = 11 : i64} {
  func.func @policy_kernel(%arg0: i32, %arg1: memref<16x32xbf16, #tpu.memory_space<vmem>>, %arg2: memref<32x256xbf16, #tpu.memory_space<vmem>>, %arg3: memref<1x256xf32, #tpu.memory_space<vmem>>, %arg4: memref<256x128xf32, #tpu.memory_space<vmem>>, %arg5: memref<1x128xf32, #tpu.memory_space<vmem>>, %arg6: memref<16x128xf32, #tpu.memory_space<vmem>>) attributes {dimension_semantics = [#tpu.dimension_semantics<parallel>], iteration_bounds = array<i64: 1>, scalar_prefetch = 0 : i64, scratch_operands = 0 : i64, tpu.core_type = #tpu.core_type<tc>, window_params = [{transform_indices = @transform_0, window_bounds = array<i64: 16, 32>}, {pipeline_mode = #tpu.pipeline_mode<synchronous>, transform_indices = @transform_1, window_bounds = array<i64: 32, 256>}, {pipeline_mode = #tpu.pipeline_mode<synchronous>, transform_indices = @transform_2, window_bounds = array<i64: 1, 256>}, {pipeline_mode = #tpu.pipeline_mode<synchronous>, transform_indices = @transform_3, window_bounds = array<i64: 256, 128>}, {pipeline_mode = #tpu.pipeline_mode<synchronous>, transform_indices = @transform_4, window_bounds = array<i64: 1, 128>}, {transform_indices = @transform_5, window_bounds = array<i64: 16, 128>}]} {
    %c0 = arith.constant 0 : index
    %c0_0 = arith.constant 0 : index
    %0 = vector.load %arg1[%c0, %c0_0] : memref<16x32xbf16, #tpu.memory_space<vmem>>, vector<16x32xbf16>
    %c0_1 = arith.constant 0 : index
    %c0_2 = arith.constant 0 : index
    %1 = vector.load %arg2[%c0_1, %c0_2] : memref<32x256xbf16, #tpu.memory_space<vmem>>, vector<32x256xbf16>
    %cst = arith.constant dense<0.000000e+00> : vector<16x256xf32>
    %2 = tpu.matmul %0, %1, %cst {dimension_numbers = #tpu.dot_dimension_numbers<[1], [0], [0], [1], [0, 0, 1, 1], [], []>} : vector<16x32xbf16>, vector<32x256xbf16>, vector<16x256xf32> -> vector<16x256xf32>
    %c0_3 = arith.constant 0 : index
    %c0_4 = arith.constant 0 : index
    %3 = vector.load %arg3[%c0_3, %c0_4] : memref<1x256xf32, #tpu.memory_space<vmem>>, vector<1x256xf32>
    %4 = vector.broadcast %3 : vector<1x256xf32> to vector<16x256xf32>
    %5 = arith.addf %2, %4 : vector<16x256xf32>
    %cst_5 = arith.constant 0.000000e+00 : f32
    %6 = vector.broadcast %cst_5 : f32 to vector<16x256xf32>
    %7 = arith.maximumf %5, %6 : vector<16x256xf32>
    %c0_6 = arith.constant 0 : index
    %c0_7 = arith.constant 0 : index
    %8 = vector.load %arg4[%c0_6, %c0_7] : memref<256x128xf32, #tpu.memory_space<vmem>>, vector<256x128xf32>
    %cst_8 = arith.constant dense<0.000000e+00> : vector<16x128xf32>
    %9 = tpu.matmul %7, %8, %cst_8 {dimension_numbers = #tpu.dot_dimension_numbers<[1], [0], [0], [1], [0, 0, 1, 1], [], []>} : vector<16x256xf32>, vector<256x128xf32>, vector<16x128xf32> -> vector<16x128xf32>
    %c0_9 = arith.constant 0 : index
    %c0_10 = arith.constant 0 : index
    %10 = vector.load %arg5[%c0_9, %c0_10] : memref<1x128xf32, #tpu.memory_space<vmem>>, vector<1x128xf32>
    %11 = vector.broadcast %10 : vector<1x128xf32> to vector<16x128xf32>
    %12 = arith.addf %9, %11 : vector<16x128xf32>
    %13 = tpu.iota {dimensions = array<i32: 1>} : vector<16x128xi32>
    %c8_i32 = arith.constant 8 : i32
    %14 = vector.broadcast %c8_i32 : i32 to vector<16x128xi32>
    %15 = arith.cmpi slt, %13, %14 : vector<16x128xi32>
    %cst_11 = arith.constant 0xFF800000 : f32
    %16 = vector.broadcast %cst_11 : f32 to vector<16x128xf32>
    %17 = arith.select %15, %12, %16 : vector<16x128xi1>, vector<16x128xf32>
    %cst_12 = arith.constant dense<0xFF800000> : vector<16xf32>
    %18 = vector.multi_reduction <maximumf>, %17, %cst_12 [1] : vector<16x128xf32> to vector<16xf32>
    %19 = vector.shape_cast %18 : vector<16xf32> to vector<16x1xf32>
    %20 = vector.broadcast %19 : vector<16x1xf32> to vector<16x128xf32>
    %21 = arith.subf %17, %20 : vector<16x128xf32>
    %22 = math.exp %21 : vector<16x128xf32>
    %cst_13 = arith.constant dense<0.000000e+00> : vector<16xf32>
    %23 = vector.multi_reduction <add>, %22, %cst_13 [1] : vector<16x128xf32> to vector<16xf32>
    %24 = vector.shape_cast %23 : vector<16xf32> to vector<16x1xf32>
    %25 = tpu.reciprocal %24 {approx = true} : vector<16x1xf32> -> vector<16x1xf32>
    %26 = arith.mulf %24, %25 : vector<16x1xf32>
    %cst_14 = arith.constant 2.000000e+00 : f32
    %27 = vector.broadcast %cst_14 : f32 to vector<16x1xf32>
    %28 = arith.subf %27, %26 : vector<16x1xf32>
    %29 = arith.mulf %25, %28 : vector<16x1xf32>
    %30 = vector.broadcast %29 : vector<16x1xf32> to vector<16x128xf32>
    %31 = arith.mulf %22, %30 : vector<16x128xf32>
    %c8_i32_15 = arith.constant 8 : i32
    %32 = vector.broadcast %c8_i32_15 : i32 to vector<16x128xi32>
    %33 = arith.cmpi eq, %13, %32 : vector<16x128xi32>
    %34 = arith.select %33, %12, %31 : vector<16x128xi1>, vector<16x128xf32>
    %c0_16 = arith.constant 0 : index
    %c0_17 = arith.constant 0 : index
    %35 = vector.load %arg6[%c0_16, %c0_17] : memref<16x128xf32, #tpu.memory_space<vmem>>, vector<16x128xf32>
    tpu.vector_store %arg6[%c0_16, %c0_17], %34 {strides = array<i32>} : memref<16x128xf32, #tpu.memory_space<vmem>>, vector<16x128xf32>,
    return
  }
  func.func @transform_0(%arg0: i32) -> (i32, i32) {
    %c0_i32 = arith.constant 0 : i32
    %c0_i32_0 = arith.constant 0 : i32
    return %arg0, %c0_i32 : i32, i32
  }
  func.func @transform_1(%arg0: i32) -> (i32, i32) {
    %c0_i32 = arith.constant 0 : i32
    %c0_i32_0 = arith.constant 0 : i32
    %c0_i32_1 = arith.constant 0 : i32
    return %c0_i32, %c0_i32_0 : i32, i32
  }
  func.func @transform_2(%arg0: i32) -> (i32, i32) {
    %c0_i32 = arith.constant 0 : i32
    %c0_i32_0 = arith.constant 0 : i32
    %c0_i32_1 = arith.constant 0 : i32
    return %c0_i32, %c0_i32_0 : i32, i32
  }
  func.func @transform_3(%arg0: i32) -> (i32, i32) {
    %c0_i32 = arith.constant 0 : i32
    %c0_i32_0 = arith.constant 0 : i32
    %c0_i32_1 = arith.constant 0 : i32
    return %c0_i32, %c0_i32_0 : i32, i32
  }
  func.func @transform_4(%arg0: i32) -> (i32, i32) {
    %c0_i32 = arith.constant 0 : i32
    %c0_i32_0 = arith.constant 0 : i32
    %c0_i32_1 = arith.constant 0 : i32
    return %c0_i32, %c0_i32_0 : i32, i32
  }
  func.func @transform_5(%arg0: i32) -> (i32, i32) {
    %c0_i32 = arith.constant 0 : i32
    %c0_i32_0 = arith.constant 0 : i32
    return %arg0, %c0_i32 : i32, i32
  }
}

</mosaic_0001>

<bundles_post_ra>
// kernel: _lambda_.1
= control target key start
LH: loop header
LB: loop body
LE: loop exit
PB: predicated region body
PF: predicated region fallthrough
CT: control target
= control target key end

     0   :  { %10 = vsyncpa [#allocation3], 0  ;;  %s402_s18 = smov [#allocation2]   ;;  %s475_s0 = inlined_call_operand.vmem [shape: bf16[16,32], index: 0, kind: input, shape index: {}]   ;;  %s476_s1 = inlined_call_operand.vmem [shape: bf16[32,256], index: 1, kind: input, shape index: {}]   ;;  %s477_s2 = inlined_call_operand.vmem [shape: f32[1,256], index: 2, kind: input, shape index: {}]   ;;  %s478_s3 = inlined_call_operand.hbm [shape: f32[256,128], index: 3, kind: input, shape index: {}]   ;;  %s479_s4 = inlined_call_operand.vmem [shape: f32[1,128], index: 4, kind: input, shape index: {}]   ;;  %s480_s5 = inlined_call_operand.vmem [shape: f32[16,128], index: 5, kind: output, shape index: {}]  }
   0x1   :  { %s22_s19 = sshll.u32 %s402_s18, 4  ;;  %s378_s22 = scalar_lea.hbm %s478_s3, 4096  ;;  %s23_s19 = int_to_ptr.vmem [resolvable:$true] %s22_s19 }
   0x2   :  { %p379_p0 = scmp.ne.s32.totalorder %s478_s3, %s378_s22  ;;  %p382_p1 = scmp.lt.u32.totalorder %s378_s22, %s478_s3 }
   0x4   :  { %p384_p2 = pnand %p382_p1, %p379_p0 }
   0x6   :  { %387 = shalt.err (!%p384_p2)
}
   0x7   :  { %s388_s27 = scalar_lea.vmem %s23_s19, 4096  ;;  %p393_p4 = scmp.lt.s32.totalorder %s23_s19, %s23_s19 }
   0x8   :  { %p389_p3 = scmp.ne.s32.totalorder %s23_s19, %s388_s27  ;;  %p394_p5 = scmp.lt.s32.totalorder %s388_s27, %s388_s27 }
   0xa   :  { %p395_p6 = por %p394_p5, %p393_p4 }
   0xc   :  { %p396_p7 = pnand %p395_p6, %p389_p3 }
   0xe   :  { %399 = shalt.err (!%p396_p7)
}
   0xf   :  { %s403_s28 = smov 128   ;;  %s404_s29 = smov 8  }
  0x10   :  { %28 = dma.hbm_to_vmem [thread:$0]  %s478_s3, 4096, %s23_s19, [#allocation3], %s403_s28, %s403_s28, %s404_s29  }
  0x11   :  { %400 = dma.done.wait [#allocation3], 4096  }
  0x12   :  { %401 = vsyncadd [#allocation3], 4294963200  ;;  %v405_v0 = vmov 0   ;;  %v363_v1 = vld [vmem:[%s476_s1 + $0x4] ss:$8 sps:$4 sm:$0xff]   ;;  %v147_v12 = vld [vmem:[#allocation2 + $0x90] sm:$0xff]  ;;  %v43_v54 = vlaneseq }
  0x13   :  { %114 = vmatprep.mubr.bf16.mxu0 %v405_v0  ;;  %v365_v2 = vld [vmem:[%s476_s1] ss:$8 sps:$4 sm:$0xff]   ;;  %82 = vmatprep.subr.bf16.mxu0 %v363_v1  ;;  %v366_v3 = vld [vmem:[%s476_s1 + $0x14] ss:$8 sps:$4 sm:$0xff]   ;;  %v368_v4 = vld [vmem:[%s476_s1 + $0x10] ss:$8 sps:$4 sm:$0xff]  }
  0x14   :  { %83 = vmatpush1.bf16.msra.mxu0 %v365_v2  ;;  %v145_v5 = vld [vmem:[#allocation2 + $0x80] sm:$0xff]  ;;  %v146_v7 = vld [vmem:[#allocation2 + $0x88] sm:$0xff]  ;;  %v148_v13 = vld [vmem:[#allocation2 + $0x98] sm:$0xff]  ;;  %vm78_vm0 = vcmask 261120   ;;  %v44_v55 = vshrl.u32 %v43_v54, 7 }
  0x15   :  { %84 = vmatprep.subr.bf16.mxu0 %v366_v3  ;;  %v369_v6 = vld [vmem:[%s475_s0] sm:$0xff]   ;;  %v130_v9 = vld [vmem:[#allocation2 + $0x8] sm:$0xff]  ;;  %v327_v10 = vpack.c.bf16 %v146_v7, %v145_v5  ;;  %v131_v14 = vld [vmem:[#allocation2 + $0x10] sm:$0xff]  ;;  %v331_v15 = vpack.c.bf16 %v148_v13, %v147_v12 }
  0x16   :  { %v129_v8 = vld [vmem:[#allocation2] sm:$0xff]  ;;  %v132_v16 = vld [vmem:[#allocation2 + $0x18] sm:$0xff]  ;;  %v150_v18 = vld [vmem:[#allocation2 + $0xa8] sm:$0xff]  ;;  %v45_v56 = vsub.s32 0, %v44_v55  ;;  %v49_v58 = vsub.s32 1, %v44_v55 }
  0x17   :  { %v329_v11 = vpack.c.bf16 %v130_v9, %v129_v8  ;;  %v149_v17 = vld [vmem:[#allocation2 + $0xa0] sm:$0xff]  ;;  %328 = vmatprep.subr.bf16.mxu1 %v327_v10  ;;  %v333_v19 = vpack.c.bf16 %v132_v16, %v131_v14  ;;  %v134_v22 = vld [vmem:[#allocation2 + $0x28] sm:$0xff]  ;;  %v151_v23 = vld [vmem:[#allocation2 + $0xb0] sm:$0xff]  ;;  %v244_v9 = vand.u32 127, %v43_v54 }
  0x18   :  { %85 = vmatpush1.bf16.msra.mxu0 %v368_v4  ;;  %v335_v20 = vpack.c.bf16 %v150_v18, %v149_v17  ;;  %v133_v21 = vld [vmem:[#allocation2 + $0x20] sm:$0xff]  ;;  %v152_v24 = vld [vmem:[#allocation2 + $0xb8] sm:$0xff]  ;;  %v135_v27 = vld [vmem:[#allocation2 + $0x30] sm:$0xff] }
  0x19   :  { %330 = vmatpush3.bf16.msra.mxu1 %v329_v11  ;;  %v337_v25 = vpack.c.bf16 %v134_v22, %v133_v21  ;;  %v339_v26 = vpack.c.bf16 %v152_v24, %v151_v23  ;;  %v136_v28 = vld [vmem:[#allocation2 + $0x38] sm:$0xff]  ;;  %v153_v29 = vld [vmem:[#allocation2 + $0xc0] sm:$0xff]  ;;  %v154_v30 = vld [vmem:[#allocation2 + $0xc8] sm:$0xff]  ;;  %vm245_vm1 = vcmp.lt.s32.totalorder %v244_v9, 8  ;;  %vm272_vm2 = vcmp.eq.s32.totalorder %v244_v9, 8 }
  0x1a   :  { %332 = vmatprep.subr.bf16.mxu1 %v331_v15  ;;  %v341_v31 = vpack.c.bf16 %v136_v28, %v135_v27  ;;  %v343_v32 = vpack.c.bf16 %v154_v30, %v153_v29  ;;  %v137_v33 = vld [vmem:[#allocation2 + $0x40] sm:$0xff]  ;;  %v138_v34 = vld [vmem:[#allocation2 + $0x48] sm:$0xff]  ;;  %v155_v35 = vld [vmem:[#allocation2 + $0xd0] sm:$0xff] }
  0x1b   :  { %287 = vmatmul.mubr.msk.bf16.vlgmr.msra.gmra.mrb[0].mxu0 %vm78_vm0, %v369_v6  ;;  %v156_v36 = vld [vmem:[#allocation2 + $0xd8] sm:$0xff]  ;;  %v345_v37 = vpack.c.bf16 %v138_v34, %v137_v33  ;;  %v139_v39 = vld [vmem:[#allocation2 + $0x50] sm:$0xff]  ;;  %v157_v41 = vld [vmem:[#allocation2 + $0xe0] sm:$0xff] }
  0x1c   :  { %v347_v38 = vpack.c.bf16 %v156_v36, %v155_v35  ;;  %v140_v40 = vld [vmem:[#allocation2 + $0x58] sm:$0xff]  ;;  %v158_v42 = vld [vmem:[#allocation2 + $0xe8] sm:$0xff]  ;;  %v141_v45 = vld [vmem:[#allocation2 + $0x60] sm:$0xff] }
  0x1d   :  { %334 = vmatpush3.bf16.msra.mxu1 %v333_v19  ;;  %v349_v43 = vpack.c.bf16 %v140_v40, %v139_v39  ;;  %v351_v44 = vpack.c.bf16 %v158_v42, %v157_v41  ;;  %v142_v46 = vld [vmem:[#allocation2 + $0x68] sm:$0xff]  ;;  %v159_v48 = vld [vmem:[#allocation2 + $0xf0] sm:$0xff]  ;;  %v160_v49 = vld [vmem:[#allocation2 + $0xf8] sm:$0xff] }
  0x1e   :  { %336 = vmatprep.subr.bf16.mxu1 %v335_v20  ;;  %v353_v47 = vpack.c.bf16 %v142_v46, %v141_v45  ;;  %v355_v50 = vpack.c.bf16 %v160_v49, %v159_v48  ;;  %v143_v51 = vld [vmem:[#allocation2 + $0x70] sm:$0xff]  ;;  %v144_v52 = vld [vmem:[#allocation2 + $0x78] sm:$0xff]  ;;  %v41_v57 = vld [vmem:[%s477_s2] sm:$0x3] }
  0x1f   :  { %v357_v53 = vpack.c.bf16 %v144_v52, %v143_v51  ;;  %v46_v59 = vrot.slane %v41_v57, %v45_v56  ;;  %v50_v60 = vrot.slane %v41_v57, %v49_v58  ;;  %v288_v12 = vld [vmem:[%s479_s4] ss:$0 sm:$0xff] }
  0x21   :  { %338 = vmatpush3.bf16.msra.mxu1 %v337_v25 }
  0x22   :  { %340 = vmatprep.subr.bf16.mxu1 %v339_v26 }
  0x25   :  { %342 = vmatpush3.bf16.msra.mxu1 %v341_v31 }
  0x26   :  { %344 = vmatprep.subr.bf16.mxu1 %v343_v32 }
  0x29   :  { %346 = vmatpush3.bf16.msra.mxu1 %v345_v37 }
  0x2a   :  { %348 = vmatprep.subr.bf16.mxu1 %v347_v38 }
  0x2d   :  { %350 = vmatpush3.bf16.msra.mxu1 %v349_v43 }
  0x2e   :  { %352 = vmatprep.subr.bf16.mxu1 %v351_v44 }
  0x31   :  { %354 = vmatpush3.bf16.msra.mxu1 %v353_v47 }
  0x32   :  { %356 = vmatprep.subr.bf16.mxu1 %v355_v50 }
  0x35   :  { %358 = vmatpush3.bf16.msra.mxu1 %v357_v53 }
  0xee   :  { %v116_v61 = vpop.f32.mrb[0].mxu0 }
  0xef   :  { %v117_v62 = vadd.f32 %v116_v61, %v46_v59  ;;  %v118_v63 = vpop.f32.mrb[1].mxu0 }
  0xf0   :  { %v120_v0 = vpop.f32.mrb[2].mxu0  ;;  %v119_v1 = vadd.f32 %v118_v63, %v50_v60 }
  0xf1   :  { %v122_v2 = vpop.f32.mrb[3].mxu0  ;;  %v125_v5 = vmax.f32 %v117_v62, 0.0  ;;  %v121_v6 = vadd.f32 %v120_v0, %v46_v59 }
  0xf2   :  { %v123_v3 = vadd.f32 %v122_v2, %v50_v60  ;;  %v126_v4 = vmax.f32 %v119_v1, 0.0 }
  0xf3   :  { %v127_v8 = vmax.f32 %v121_v6, 0.0 }
  0xf4   :  { %v128_v7 = vmax.f32 %v123_v3, 0.0  ;;  %232 = vmatprep.mubr.f32.mxu1 %v126_v4 }
  0xf5   :  { %233 = vmatmul.mubr.f32.vlgmr.msra.gmra.mrb[0].mxu1 %v125_v5 }
  0xf6   :  { %237 = vmatprep.mubr.f32.mxu1 %v128_v7 }
  0xf9   :  { %238 = vmatmul.mubr.f32.gmra.mrb[2].mxu1 %v127_v8 }
 0x1c8   :  { %v321_v10 = vpop.f32.mrb[0].mxu1 }
 0x1c9   :  { %v322_v11 = vpop.f32.mrb[1].mxu1 }
 0x1ca   :  { %v323_v13 = vadd.f32 %v322_v11, %v321_v10 }
 0x1cc   :  { %v324_v14 = vpop.f32.mrb[2].mxu1  ;;  %v235_v15 = vadd.f32 %v323_v13, %v288_v12 }
 0x1cd   :  { %v325_v16 = vpop.f32.mrb[3].mxu1 }
 0x1ce   :  { %v326_v17 = vadd.f32 %v325_v16, %v324_v14  ;;  %v246_v18 = vsel %vm245_vm1, %v235_v15, -inf }
 0x1cf   :  { %248 = vmax.xlane.f32.xlu0 %v246_v18 }
 0x1d0   :  { %v240_v19 = vadd.f32 %v326_v17, %v288_v12 }
 0x1d2   :  { %v247_v20 = vsel %vm245_vm1, %v240_v19, -inf }
 0x1d3   :  { %250 = vmax.xlane.f32.xlu0 %v247_v20 }
 0x25c   :  { %v249_v21 = vpop.xlane.xlu0 %248 }
 0x25d   :  { %v252_v22 = vsub.f32 %v246_v18, %v249_v21 }
 0x25f   :  { %v254_v23 = vmul.f32 1.442695, %v252_v22 }
 0x260   :  { %v251_v24 = vpop.xlane.xlu0 %250 }
 0x261   :  { %370 = vpow2.f32 %v254_v23  ;;  %v253_v25 = vsub.f32 %v247_v20, %v251_v24 }
 0x263   :  { %v256_v26 = vmul.f32 1.442695, %v253_v25 }
 0x265   :  { %372 = vpow2.f32 %v256_v26 }
 0x26b   :  { %v371_v27 = vpop.eup %370 }
 0x26c   :  { %258 = vadd.xlane.f32.xlu1 %v371_v27 }
 0x26f   :  { %v373_v28 = vpop.eup %372 }
 0x270   :  { %260 = vadd.xlane.f32.xlu1 %v373_v28 }
 0x2f9   :  { %v259_v29 = vpop.xlane.xlu1 %258 }
 0x2fa   :  { %374 = vrcp.f32 %v259_v29 }
 0x2fd   :  { %v261_v30 = vpop.xlane.xlu1 %260 }
 0x2fe   :  { %376 = vrcp.f32 %v261_v30 }
 0x304   :  { %v375_v31 = vpop.eup %374 }
 0x305   :  { %v264_v32 = vmul.f32 %v375_v31, %v259_v29 }
 0x307   :  { %v266_v33 = vsub.f32 2.0, %v264_v32 }
 0x308   :  { %v377_v34 = vpop.eup %376 }
 0x309   :  { %v268_v35 = vmul.f32 %v375_v31, %v266_v33  ;;  %v265_v36 = vmul.f32 %v377_v34, %v261_v30 }
 0x30b   :  { %v270_v37 = vmul.f32 %v371_v27, %v268_v35  ;;  %v267_v38 = vsub.f32 2.0, %v265_v36 }
 0x30d   :  { %v273_v39 = vsel %vm272_vm2, %v235_v15, %v270_v37  ;;  %v269_v40 = vmul.f32 %v377_v34, %v267_v38 }
 0x30e   :  { %275 = vst [vmem:[%s480_s5] sm:$0xff] %v273_v39 }
 0x30f   :  { %v271_v41 = vmul.f32 %v373_v28, %v269_v40 }
 0x311   :  { %v274_v42 = vsel %vm272_vm2, %v240_v19, %v271_v41 }
 0x312   :  { %276 = vst [vmem:[%s480_s5 + $0x8] sm:$0xff] %v274_v42 }
 0x313   :  { %281 = vsyncpa [#allocation3], 1 }

</bundles_post_ra>
